<compile_context>
chip_gen: v7x
topology: tpu7x:2x2x1
jax: 0.10.0
libtpu: 0.0.40
codegen_flags: <defaults>
</compile_context>

<pallas_src>
import jax
import jax.numpy as jnp
from jax.experimental import pallas as pl
from jax.experimental.pallas import tpu as pltpu


def _round_up(x: int, m: int) -> int:
    return ((x + m - 1) // m) * m


# --------------------------------------------------------------------------
# Single-sample path: grid-less VPU GEMV (whole ~72 KiB working set in VMEM).
# --------------------------------------------------------------------------
def _gemv_kernel(x_ref, wt_ref, b_ref, o_ref):
    """x:(1,N)  wt:(C,N)  b:(C,1)  ->  o:(C,1).

    Sublane-broadcast of x, f32 VPU multiply, XLU lane reduce.  No MXU: a
    (1,N)x(N,8) matmul would be <1% utilized on a 16x-lane-padded weight.
    """
    prod = wt_ref[...] * x_ref[...]                                   # (C, N)
    o_ref[...] = jnp.sum(prod, axis=-1, keepdims=True) + b_ref[...]   # (C, 1)


def pallas_predict_single(x_flat, w_t, b_col):
    """predict_fn: (N,) f32 -> (C,) f32.  Single pallas_call, no grid."""
    c, n = w_t.shape
    x_row = x_flat.reshape(1, n).astype(jnp.float32)

    cost = pl.CostEstimate(
        flops=2 * n * c,
        transcendentals=0,
        bytes_accessed=4 * (n + n * c + 2 * c),
    )
    out = pl.pallas_call(
        _gemv_kernel,
        out_shape=jax.ShapeDtypeStruct((c, 1), jnp.float32),
        in_specs=[
            pl.BlockSpec(memory_space=pltpu.MemorySpace.VMEM),  # x   (1, N)
            pl.BlockSpec(memory_space=pltpu.MemorySpace.VMEM),  # W^T (C, N)
            pl.BlockSpec(memory_space=pltpu.MemorySpace.VMEM),  # b   (C, 1)
        ],
        out_specs=pl.BlockSpec(memory_space=pltpu.MemorySpace.VMEM),
        cost_estimate=cost,
    )(x_row, w_t, b_col)
    return out[:, 0]                                                  # (C,)


# --------------------------------------------------------------------------
# Batched path: many perturbed inputs per call, MXU matmul, parallel M-grid.
# --------------------------------------------------------------------------
def _batched_gemm_kernel(x_ref, w_ref, b_ref, o_ref):
    """x:(tm,N)  w:(N,C)  b:(1,C)  ->  o:(tm,C) (lane-dense, f32 acc)."""
    o_ref[...] = (
        jnp.dot(x_ref[...], w_ref[...], preferred_element_type=jnp.float32)
        + b_ref[...]
    ).astype(o_ref.dtype)


def pallas_predict_batched(x_rows, w, b_row, *, tm=128):
    """Batched predict_fn: (M, N) f32 -> (M, C) f32, one pallas_call."""
    m, n = x_rows.shape
    n2, c = w.shape
    assert n == n2
    x_rows = x_rows.astype(jnp.float32)

    tm = min(tm, _round_up(m, 8))          # sublane-aligned row tile
    m_pad = _round_up(m, tm)
    if m_pad != m:
        x_rows = jnp.pad(x_rows, ((0, m_pad - m), (0, 0)))
    grid = (m_pad // tm,)

    cost = pl.CostEstimate(
        flops=2 * m_pad * n * c,
        transcendentals=0,
        bytes_accessed=4 * (m_pad * n + n * c + c + m_pad * c),
    )
    out = pl.pallas_call(
        _batched_gemm_kernel,
        out_shape=jax.ShapeDtypeStruct((m_pad, c), jnp.float32),
        grid_spec=pltpu.PrefetchScalarGridSpec(
            num_scalar_prefetch=0,
            grid=grid,
            in_specs=[
                pl.BlockSpec((tm, n), lambda i: (i, 0)),   # row tile of x
                pl.BlockSpec((n, c), lambda i: (0, 0)),    # W resident, reused
                pl.BlockSpec((1, c), lambda i: (0, 0)),    # bias resident
            ],
            out_specs=pl.BlockSpec((tm, c), lambda i: (i, 0)),
        ),
        # "parallel" lets v7x's two TensorCores each take half the row tiles;
        # no effect (and no cost) on single-TC v5e/v6e.
        compiler_params=pltpu.CompilerParams(dimension_semantics=("parallel",)),
        cost_estimate=cost,
    )(x_rows, w, b_row)
    return out[:m]


# --------------------------------------------------------------------------
# Net.forward equivalents (single jit around flatten -> kernel -> expand_dims).
# --------------------------------------------------------------------------
@jax.jit
def net_forward(x, w_t, b_col):
    """Mirrors Net.forward for one input: flatten -> predict_fn -> expand_dims."""
    x_flat = x.reshape(-1).astype(jnp.float32)     # x.flatten()
    res = pallas_predict_single(x_flat, w_t, b_col)
    return jnp.expand_dims(res, 0)                 # np.expand_dims(res, 0)


@jax.jit
def net_forward_batched(xs, w, b_row):
    """XAI-style usage: M perturbed inputs through the same predict_fn."""
    m = xs.shape[0]
    xs_flat = xs.reshape(m, -1).astype(jnp.float32)
    return pallas_predict_batched(xs_flat, w, b_row)   # (M, C)


if __name__ == "__main__":
    # Small shapes consistent with an NCHW image input.
    B, C_in, H, W_sp = 2, 4, 16, 16
    N = B * C_in * H * W_sp            # 2048 flattened features
    C_out = 8                          # prediction length
    M = 200                            # number of perturbed inputs (batched path)

    key = jax.random.PRNGKey(0)
    kx, kw, kb, kp = jax.random.split(key, 4)

    x = jax.random.normal(kx, (B, C_in, H, W_sp), dtype=jnp.float32)
    w = jax.random.normal(kw, (N, C_out), dtype=jnp.float32) * 0.02
    b = jax.random.normal(kb, (C_out,), dtype=jnp.float32)

    # Init-time, device-resident layouts (computed ONCE, never per forward).
    w_t = jnp.asarray(w.T)             # (C_out, N)  for the single-sample kernel
    b_col = b.reshape(C_out, 1)        # (C_out, 1)
    b_row = b.reshape(1, C_out)        # (1, C_out)  for the batched kernel

    # ---- single-sample forward (exact Net.forward semantics) ----
    out1 = jax.block_until_ready(net_forward(x, w_t, b_col))
    ref1 = jnp.expand_dims(
        jnp.dot(x.reshape(-1), w, precision=jax.lax.Precision.HIGHEST) + b, 0
    )
    assert out1.shape == (1, C_out)
    assert jnp.allclose(out1, ref1, atol=1e-3, rtol=1e-3)

    # ---- batched forward (M perturbed inputs in one kernel call) ----
    xs = x[None] + 0.05 * jax.random.normal(kp, (M,) + x.shape, dtype=jnp.float32)
    out2 = jax.block_until_ready(net_forward_batched(xs, w, b_row))
    ref2 = jnp.dot(xs.reshape(M, -1), w, precision=jax.lax.Precision.HIGHEST) + b
    assert out2.shape == (M, C_out)
    assert jnp.allclose(out2, ref2, atol=1e-3, rtol=1e-3)

    print("KERNEL_OK")
</pallas_src>

<mosaic_0001>
module attributes {stable_mosaic.version = 11 : i64} {
  func.func @_gemv_kernel(%arg0: memref<1x2048xf32, #tpu.memory_space<vmem>>, %arg1: memref<8x2048xf32, #tpu.memory_space<vmem>>, %arg2: memref<8x1xf32, #tpu.memory_space<vmem>>, %arg3: memref<8x1xf32, #tpu.memory_space<vmem>>) attributes {dimension_semantics = [], scalar_prefetch = 0 : i64, scratch_operands = 0 : i64, tpu.core_type = #tpu.core_type<tc>} {
    %c0 = arith.constant 0 : index
    %c0_0 = arith.constant 0 : index
    %0 = vector.load %arg1[%c0, %c0_0] : memref<8x2048xf32, #tpu.memory_space<vmem>>, vector<8x2048xf32>
    %c0_1 = arith.constant 0 : index
    %c0_2 = arith.constant 0 : index
    %1 = vector.load %arg0[%c0_1, %c0_2] : memref<1x2048xf32, #tpu.memory_space<vmem>>, vector<1x2048xf32>
    %2 = vector.broadcast %1 : vector<1x2048xf32> to vector<8x2048xf32>
    %3 = arith.mulf %0, %2 : vector<8x2048xf32>
    %cst = arith.constant dense<0.000000e+00> : vector<8xf32>
    %4 = vector.multi_reduction <add>, %3, %cst [1] : vector<8x2048xf32> to vector<8xf32>
    %5 = vector.shape_cast %4 : vector<8xf32> to vector<8x1xf32>
    %c0_3 = arith.constant 0 : index
    %c0_4 = arith.constant 0 : index
    %6 = vector.load %arg2[%c0_3, %c0_4] : memref<8x1xf32, #tpu.memory_space<vmem>>, vector<8x1xf32>
    %7 = arith.addf %5, %6 : vector<8x1xf32>
    %c0_5 = arith.constant 0 : index
    %c0_6 = arith.constant 0 : index
    %8 = vector.load %arg3[%c0_5, %c0_6] : memref<8x1xf32, #tpu.memory_space<vmem>>, vector<8x1xf32>
    tpu.vector_store %arg3[%c0_5, %c0_6], %7 {strides = array<i32>} : memref<8x1xf32, #tpu.memory_space<vmem>>, vector<8x1xf32>,
    return
  }
}

</mosaic_0001>

<bundles_post_ra>
// kernel: net_forward.1
= control target key start
LH: loop header
LB: loop body
LE: loop exit
PB: predicated region body
PF: predicated region fallthrough
CT: control target
= control target key end

     0   :  { %v34_v0 = vlaneseq  ;;  %vm149_vm0 = vcmask 7168   ;;  %s245_s0 = inlined_call_operand.vmem [shape: f32[1,2048], index: 0, kind: input, shape index: {}]   ;;  %s246_s1 = inlined_call_operand.vmem [shape: f32[8,2048], index: 1, kind: input, shape index: {}]   ;;  %s247_s2 = inlined_call_operand.vmem [shape: f32[8,1], index: 2, kind: input, shape index: {}]   ;;  %s248_s3 = inlined_call_operand.vmem [shape: f32[8,1], index: 3, kind: output, shape index: {}]  }
   0x1   :  { %v30_v5 = vld [vmem:[%s245_s0] sm:$0xff]  ;;  %v15_v10 = vld [vmem:[%s246_s1 + $0x8] sm:$0xff]  ;;  %v16_v13 = vld [vmem:[%s246_s1 + $0x10] sm:$0xff] }
   0x2   :  { %v175_v1 = vshrl.u32 %v34_v0, 7  ;;  %v14_v9 = vld [vmem:[%s246_s1] sm:$0xff]  ;;  %v17_v18 = vld [vmem:[%s246_s1 + $0x18] sm:$0xff]  ;;  %v19_v27 = vld [vmem:[%s246_s1 + $0x28] sm:$0xff] }
   0x3   :  { %v18_v22 = vld [vmem:[%s246_s1 + $0x20] sm:$0xff]  ;;  %v20_v31 = vld [vmem:[%s246_s1 + $0x30] sm:$0xff]  ;;  %v31_v32 = vld [vmem:[%s245_s0 + $0x8] sm:$0xff] }
   0x4   :  { %v36_v2 = vsub.s32 0, %v175_v1  ;;  %v40_v3 = vsub.s32 1, %v175_v1  ;;  %v44_v4 = vsub.s32 2, %v175_v1  ;;  %v48_v8 = vsub.s32 3, %v175_v1  ;;  %v21_v36 = vld [vmem:[%s246_s1 + $0x38] sm:$0xff]  ;;  %v22_v40 = vld [vmem:[%s246_s1 + $0x40] sm:$0xff] }
   0x5   :  { %v52_v12 = vsub.s32 4, %v175_v1  ;;  %v56_v15 = vsub.s32 5, %v175_v1  ;;  %v60_v20 = vsub.s32 6, %v175_v1  ;;  %v64_v24 = vsub.s32 7, %v175_v1  ;;  %v23_v44 = vld [vmem:[%s246_s1 + $0x48] sm:$0xff]  ;;  %v24_v48 = vld [vmem:[%s246_s1 + $0x50] sm:$0xff] }
   0x6   :  { %v37_v6 = vrot.slane %v30_v5, %v36_v2  ;;  %v41_v7 = vrot.slane %v30_v5, %v40_v3  ;;  %v45_v11 = vrot.slane %v30_v5, %v44_v4  ;;  %v49_v14 = vrot.slane %v30_v5, %v48_v8  ;;  %v25_v52 = vld [vmem:[%s246_s1 + $0x58] sm:$0xff]  ;;  %v26_v56 = vld [vmem:[%s246_s1 + $0x60] sm:$0xff]  ;;  %v27_v60 = vld [vmem:[%s246_s1 + $0x68] sm:$0xff] }
   0x7   :  { %v53_v19 = vrot.slane %v30_v5, %v52_v12  ;;  %v57_v23 = vrot.slane %v30_v5, %v56_v15  ;;  %v61_v28 = vrot.slane %v30_v5, %v60_v20  ;;  %v65_v33 = vrot.slane %v30_v5, %v64_v24  ;;  %v28_v0 = vld [vmem:[%s246_s1 + $0x70] sm:$0xff] }
   0x8   :  { %v114_v16 = vmul.f32 %v37_v6, %v14_v9  ;;  %v115_v17 = vmul.f32 %v41_v7, %v15_v10  ;;  %v116_v21 = vmul.f32 %v45_v11, %v16_v13  ;;  %v117_v25 = vmul.f32 %v49_v14, %v17_v18  ;;  %v147_v11 = vld [vmem:[%s247_s2] sm:$0xff] }
   0x9   :  { %v118_v29 = vmul.f32 %v53_v19, %v18_v22  ;;  %v119_v34 = vmul.f32 %v57_v23, %v19_v27  ;;  %v69_v37 = vrot.slane %v31_v32, %v36_v2  ;;  %v120_v38 = vmul.f32 %v61_v28, %v20_v31 }
   0xa   :  { %v130_v26 = vadd.f32 %v115_v17, %v114_v16  ;;  %v73_v41 = vrot.slane %v31_v32, %v40_v3  ;;  %v121_v42 = vmul.f32 %v65_v33, %v21_v36  ;;  %v77_v45 = vrot.slane %v31_v32, %v44_v4  ;;  %v29_v4 = vld [vmem:[%s246_s1 + $0x78] sm:$0xff] }
   0xb   :  { %v122_v46 = vmul.f32 %v69_v37, %v22_v40  ;;  %v81_v49 = vrot.slane %v31_v32, %v48_v8  ;;  %v85_v53 = vrot.slane %v31_v32, %v52_v12  ;;  %v89_v57 = vrot.slane %v31_v32, %v56_v15 }
   0xc   :  { %v131_v30 = vadd.f32 %v130_v26, %v116_v21  ;;  %v123_v50 = vmul.f32 %v73_v41, %v23_v44  ;;  %v124_v54 = vmul.f32 %v77_v45, %v24_v48  ;;  %v93_v61 = vrot.slane %v31_v32, %v60_v20 }
   0xd   :  { %v125_v58 = vmul.f32 %v81_v49, %v25_v52  ;;  %v126_v62 = vmul.f32 %v85_v53, %v26_v56  ;;  %v97_v1 = vrot.slane %v31_v32, %v64_v24  ;;  %v127_v2 = vmul.f32 %v89_v57, %v27_v60 }
   0xe   :  { %v132_v35 = vadd.f32 %v131_v30, %v117_v25  ;;  %v128_v5 = vmul.f32 %v93_v61, %v28_v0 }
   0xf   :  { %v129_v7 = vmul.f32 %v97_v1, %v29_v4 }
  0x10   :  { %v133_v39 = vadd.f32 %v132_v35, %v118_v29 }
  0x12   :  { %v134_v43 = vadd.f32 %v133_v39, %v119_v34 }
  0x14   :  { %v135_v47 = vadd.f32 %v134_v43, %v120_v38 }
  0x16   :  { %v136_v51 = vadd.f32 %v135_v47, %v121_v42 }
  0x18   :  { %v137_v55 = vadd.f32 %v136_v51, %v122_v46 }
  0x1a   :  { %v138_v59 = vadd.f32 %v137_v55, %v123_v50 }
  0x1c   :  { %v139_v63 = vadd.f32 %v138_v59, %v124_v54 }
  0x1e   :  { %v140_v3 = vadd.f32 %v139_v63, %v125_v58 }
  0x20   :  { %v141_v6 = vadd.f32 %v140_v3, %v126_v62 }
  0x22   :  { %v142_v8 = vadd.f32 %v141_v6, %v127_v2 }
  0x24   :  { %v143_v9 = vadd.f32 %v142_v8, %v128_v5 }
  0x26   :  { %v144_v10 = vadd.f32 %v143_v9, %v129_v7 }
  0x28   :  { %145 = vadd.xlane.f32.xlu0 %v144_v10 }
  0xb5   :  { %v146_v12 = vpop.xlane.xlu0 %145 }
  0xb6   :  { %v148_v13 = vadd.f32 %v147_v11, %v146_v12 }
  0xb8   :  { %150 = vst.msk [vmem:[%s248_s3] sm:$0xff] %vm149_vm0, %v148_v13 }

</bundles_post_ra>
